<compile_context>
chip_gen: v7x
topology: tpu7x:2x2x1
jax: 0.10.0
libtpu: 0.0.40
codegen_flags: <defaults>
</compile_context>

<pallas_src>
import functools
import numpy as np
import jax
import jax.numpy as jnp
from jax.experimental import pallas as pl
from jax.experimental.pallas import tpu as pltpu


def _conv_bn_kernel(w_ref, p_ref, scale_ref, shift_ref, o_ref):
    # (Cout, K) @ (K, tm) on the MXU (bf16 in, f32 accumulate), BN affine in f32,
    # single bf16 store (lane-dense, unmasked: tm is a multiple of 128).
    acc = jnp.dot(w_ref[...], p_ref[...], preferred_element_type=jnp.float32)
    o_ref[...] = (acc * scale_ref[...] + shift_ref[...]).astype(o_ref.dtype)


def _pick_tile_m(howo, tile_m):
    """Lane-tile width: ceil-split Ho*Wo into <= tile_m chunks, rounded up to 128.

    Keeps tiles large (never degenerates toward 128 like an exact-divisor search)
    and bounds padding to < 128 columns per tile.
    """
    tile_m = max(128, (int(tile_m) // 128) * 128)
    num_tiles = -(-howo // tile_m)
    per_tile = -(-howo // num_tiles)
    return -(-per_tile // 128) * 128


@functools.partial(jax.jit, static_argnames=("stride", "eps", "tile_m", "out_dtype"))
def firstconv3x3_forward(x_nchw, weight, gamma, beta, running_mean, running_var,
                         stride=2, eps=1e-5, tile_m=32768, out_dtype=jnp.bfloat16):
    N, Cin, H, W = x_nchw.shape
    Cout = weight.shape[0]
    k, pad = 3, 1
    Ho = (H + 2 * pad - k) // stride + 1
    Wo = (W + 2 * pad - k) // stride + 1
    HoWo = Ho * Wo
    K = k * k * Cin

    # --- glue (XLA): pad the NCHW input (bf16) and gather the 9 taps straight into
    # a lane-dense (N, K, Ho*Wo) patch tensor — no transpose over the big tensor. ---
    xp = jnp.pad(x_nchw.astype(jnp.bfloat16),
                 ((0, 0), (0, 0), (pad, pad), (pad, pad)))
    taps = []
    for kh in range(k):
        for kw in range(k):
            taps.append(xp[:, :, kh:kh + stride * (Ho - 1) + 1:stride,
                               kw:kw + stride * (Wo - 1) + 1:stride])
    # (N, 9, Cin, Ho, Wo) -> (N, K, Ho*Wo); K index = (kh*3 + kw)*Cin + c
    patches = jnp.stack(taps, axis=1).reshape(N, K, HoWo)

    tm = _pick_tile_m(HoWo, tile_m)
    grid_m = pl.cdiv(HoWo, tm)
    HoWo_pad = grid_m * tm
    if HoWo_pad != HoWo:
        patches = jnp.pad(patches, ((0, 0), (0, 0), (0, HoWo_pad - HoWo)))

    # Weights in the matching K order (kh, kw, c); BN affine stays f32 post-accumulate.
    w_mat = jnp.transpose(weight, (0, 2, 3, 1)).reshape(Cout, K).astype(jnp.bfloat16)
    inv_std = 1.0 / jnp.sqrt(running_var.astype(jnp.float32) + eps)
    scale = (gamma.astype(jnp.float32) * inv_std).reshape(Cout, 1)
    shift = (beta.astype(jnp.float32)
             - running_mean.astype(jnp.float32) * scale[:, 0]).reshape(Cout, 1)

    out_isize = jnp.dtype(out_dtype).itemsize
    cost = pl.CostEstimate(
        flops=2 * N * HoWo_pad * K * Cout,
        transcendentals=0,
        bytes_accessed=(N * K * HoWo_pad * 2            # streamed bf16 patches
                        + Cout * K * 2 + Cout * 8       # resident weights + BN affine
                        + N * Cout * HoWo_pad * out_isize))

    out_padded = pl.pallas_call(
        _conv_bn_kernel,
        out_shape=jax.ShapeDtypeStruct((N, Cout, HoWo_pad), out_dtype),
        grid_spec=pltpu.PrefetchScalarGridSpec(
            num_scalar_prefetch=0,
            grid=(N, grid_m),
            in_specs=[
                pl.BlockSpec((Cout, K), lambda n, j: (0, 0)),          # weights (resident)
                pl.BlockSpec((None, K, tm), lambda n, j: (n, 0, j)),   # patch columns (streamed)
                pl.BlockSpec((Cout, 1), lambda n, j: (0, 0)),          # BN scale (resident)
                pl.BlockSpec((Cout, 1), lambda n, j: (0, 0)),          # BN shift (resident)
            ],
            out_specs=pl.BlockSpec((None, Cout, tm), lambda n, j: (n, 0, j)),
        ),
        compiler_params=pltpu.CompilerParams(
            dimension_semantics=("parallel", "parallel"),
            vmem_limit_bytes=48 * 1024 * 1024),
        cost_estimate=cost,
    )(w_mat, patches, scale, shift)

    # Layout is already NCHW; drop pad columns (no-op when Ho*Wo % 128 == 0) and reshape.
    return out_padded[:, :, :HoWo].reshape(N, Cout, Ho, Wo)


if __name__ == "__main__":
    key = jax.random.PRNGKey(0)
    kx, kw, kg, kb, km, kv = jax.random.split(key, 6)

    # ReActNet's first conv: inp=3, oup=32, stride=2 (small spatial for the test)
    N, Cin, H, W = 2, 3, 16, 16
    Cout, stride = 32, 2

    x = jax.random.normal(kx, (N, Cin, H, W), jnp.float32)
    weight = jax.random.normal(kw, (Cout, Cin, 3, 3), jnp.float32) * 0.1
    gamma = 1.0 + 0.1 * jax.random.normal(kg, (Cout,), jnp.float32)
    beta = 0.1 * jax.random.normal(kb, (Cout,), jnp.float32)
    running_mean = 0.1 * jax.random.normal(km, (Cout,), jnp.float32)
    running_var = jax.nn.softplus(jax.random.normal(kv, (Cout,), jnp.float32)) + 0.5

    out = firstconv3x3_forward(x, weight, gamma, beta, running_mean, running_var,
                               stride=stride)
    out = jax.block_until_ready(out)

    # Reference: XLA f32 conv + eval-mode BN. Kernel streams bf16 and emits bf16,
    # so tolerance is loosened accordingly.
    eps = 1e-5
    ref = jax.lax.conv_general_dilated(
        x, weight, (stride, stride), ((1, 1), (1, 1)),
        dimension_numbers=("NCHW", "OIHW", "NCHW"))
    ref = (ref - running_mean[None, :, None, None]) / jnp.sqrt(
        running_var + eps)[None, :, None, None]
    ref = ref * gamma[None, :, None, None] + beta[None, :, None, None]

    assert out.shape == (N, Cout, H // stride, W // stride)
    out_f32 = np.asarray(out.astype(jnp.float32))
    ref_np = np.asarray(ref)
    assert np.allclose(out_f32, ref_np, atol=5e-2, rtol=5e-2), (
        "max abs diff = %g" % float(np.max(np.abs(out_f32 - ref_np))))

    print("KERNEL_OK")
</pallas_src>

<mosaic_0001>
module attributes {stable_mosaic.version = 11 : i64} {
  func.func @_conv_bn_kernel(%arg0: i32, %arg1: i32, %arg2: memref<32x27xbf16, #tpu.memory_space<vmem>>, %arg3: memref<1x27x128xbf16, #tpu.memory_space<vmem>>, %arg4: memref<32x1xf32, #tpu.memory_space<vmem>>, %arg5: memref<32x1xf32, #tpu.memory_space<vmem>>, %arg6: memref<1x32x128xbf16, #tpu.memory_space<vmem>>) attributes {dimension_semantics = [#tpu.dimension_semantics<parallel>, #tpu.dimension_semantics<parallel>], iteration_bounds = array<i64: 2, 1>, scalar_prefetch = 0 : i64, scratch_operands = 0 : i64, tpu.core_type = #tpu.core_type<tc>, window_params = [{pipeline_mode = #tpu.pipeline_mode<synchronous>, transform_indices = @transform_0, window_bounds = array<i64: 32, 27>}, {transform_indices = @transform_1, window_bounds = array<i64: 1, 27, 128>}, {pipeline_mode = #tpu.pipeline_mode<synchronous>, transform_indices = @transform_2, window_bounds = array<i64: 32, 1>}, {pipeline_mode = #tpu.pipeline_mode<synchronous>, transform_indices = @transform_3, window_bounds = array<i64: 32, 1>}, {transform_indices = @transform_4, window_bounds = array<i64: 1, 32, 128>}]} {
    %c0 = arith.constant 0 : index
    %c0_0 = arith.constant 0 : index
    %0 = vector.load %arg2[%c0, %c0_0] : memref<32x27xbf16, #tpu.memory_space<vmem>>, vector<32x27xbf16>
    %c0_1 = arith.constant 0 : index
    %c0_2 = arith.constant 0 : index
    %c0_3 = arith.constant 0 : index
    %1 = vector.load %arg3[%c0_1, %c0_2, %c0_3] : memref<1x27x128xbf16, #tpu.memory_space<vmem>>, vector<1x27x128xbf16>
    %2 = vector.shape_cast %1 : vector<1x27x128xbf16> to vector<27x128xbf16>
    %cst = arith.constant dense<0.000000e+00> : vector<32x128xf32>
    %3 = tpu.matmul %0, %2, %cst {dimension_numbers = #tpu.dot_dimension_numbers<[1], [0], [0], [1], [0, 0, 1, 1], [], []>} : vector<32x27xbf16>, vector<27x128xbf16>, vector<32x128xf32> -> vector<32x128xf32>
    %c0_4 = arith.constant 0 : index
    %c0_5 = arith.constant 0 : index
    %4 = vector.load %arg4[%c0_4, %c0_5] : memref<32x1xf32, #tpu.memory_space<vmem>>, vector<32x1xf32>
    %5 = vector.broadcast %4 : vector<32x1xf32> to vector<32x128xf32>
    %6 = arith.mulf %3, %5 : vector<32x128xf32>
    %c0_6 = arith.constant 0 : index
    %c0_7 = arith.constant 0 : index
    %7 = vector.load %arg5[%c0_6, %c0_7] : memref<32x1xf32, #tpu.memory_space<vmem>>, vector<32x1xf32>
    %8 = vector.broadcast %7 : vector<32x1xf32> to vector<32x128xf32>
    %9 = arith.addf %6, %8 : vector<32x128xf32>
    %10 = arith.truncf %9 : vector<32x128xf32> to vector<32x128xbf16>
    %c0_8 = arith.constant 0 : index
    %c0_9 = arith.constant 0 : index
    %c0_10 = arith.constant 0 : index
    %11 = vector.load %arg6[%c0_8, %c0_9, %c0_10] : memref<1x32x128xbf16, #tpu.memory_space<vmem>>, vector<1x32x128xbf16>
    %12 = vector.shape_cast %11 : vector<1x32x128xbf16> to vector<32x128xbf16>
    %13 = vector.shape_cast %10 : vector<32x128xbf16> to vector<1x32x128xbf16>
    tpu.vector_store %arg6[%c0_8, %c0_9, %c0_10], %13 {strides = array<i32>} : memref<1x32x128xbf16, #tpu.memory_space<vmem>>, vector<1x32x128xbf16>,
    return
  }
  func.func @transform_0(%arg0: i32, %arg1: i32) -> (i32, i32) {
    %c0_i32 = arith.constant 0 : i32
    %c0_i32_0 = arith.constant 0 : i32
    %c0_i32_1 = arith.constant 0 : i32
    return %c0_i32, %c0_i32_0 : i32, i32
  }
  func.func @transform_1(%arg0: i32, %arg1: i32) -> (i32, i32, i32) {
    %c0_i32 = arith.constant 0 : i32
    %c0_i32_0 = arith.constant 0 : i32
    return %arg0, %c0_i32, %arg1 : i32, i32, i32
  }
  func.func @transform_2(%arg0: i32, %arg1: i32) -> (i32, i32) {
    %c0_i32 = arith.constant 0 : i32
    %c0_i32_0 = arith.constant 0 : i32
    %c0_i32_1 = arith.constant 0 : i32
    return %c0_i32, %c0_i32_0 : i32, i32
  }
  func.func @transform_3(%arg0: i32, %arg1: i32) -> (i32, i32) {
    %c0_i32 = arith.constant 0 : i32
    %c0_i32_0 = arith.constant 0 : i32
    %c0_i32_1 = arith.constant 0 : i32
    return %c0_i32, %c0_i32_0 : i32, i32
  }
  func.func @transform_4(%arg0: i32, %arg1: i32) -> (i32, i32, i32) {
    %c0_i32 = arith.constant 0 : i32
    %c0_i32_0 = arith.constant 0 : i32
    return %arg0, %c0_i32, %arg1 : i32, i32, i32
  }
}

</mosaic_0001>

<bundles_post_ra>
// kernel: firstconv3x3_forward.1
= control target key start
LH: loop header
LB: loop body
LE: loop exit
PB: predicated region body
PF: predicated region fallthrough
CT: control target
= control target key end

     0   :  { %s614_s15 = smov 0   ;;  %s616_s16 = smov 0   ;;  %s687_s0 = inlined_call_operand.vmem [shape: bf16[32,27], index: 0, kind: input, shape index: {}]   ;;  %s688_s1 = inlined_call_operand.vmem [shape: bf16[2,27,128], index: 1, kind: input, shape index: {}]   ;;  %s689_s2 = inlined_call_operand.vmem [shape: f32[32,1], index: 2, kind: input, shape index: {}]   ;;  %s690_s3 = inlined_call_operand.vmem [shape: f32[32,1], index: 3, kind: input, shape index: {}]   ;;  %s691_s4 = inlined_call_operand.vmem [shape: bf16[2,32,128], index: 4, kind: output, shape index: {}]  }
   0x1   :  { %s618_s17 = smov 0  }
   0x2 LB: > { %s26_s18 = sadd.s32 1, %s581_s16  ;;  %p485_p0 = scmp.ge.s32.totalorder %s585_s17, 1  ;;  %s585_s17 = sphi %s618_s17, %s14_s17   ;;  %s581_s16 = sphi %s616_s16, %s693_s16   ;;  %s577_s15 = sphi %s614_s15, %s692_s15  }
   0x3   : > { %p28_p1 = scmp.ge.s32.totalorder %s26_s18, 2  ;;  %p181_p2 = scmp.lt.s32.totalorder %s585_s17, 3 }
   0x5   : > { %s695_s18 = smov (%p28_p1, %s26_s18), 0  ;;  %p182_p3 = pnand %p485_p0, %p181_p2 }
   0x6   : > { %p213_p4 = scmp.lt.s32.totalorder (!%p182_p3), %s577_s15, 1  ;;  %vm266_vm0 = vcmask (!%p182_p3), 1044480   ;;  %v561_v0 = vld [vmem:[%s687_s0] sm:$0xff] (!%p182_p3)   ;;  %vm259_vm1 = vcmask (!%p182_p3), 220160   ;;  %vm267_vm2 = vcmask (!%p182_p3), 1045504   ;;  %v587_v1 = vmov (!%p182_p3), 65535  }
   0x7   : > { %185 = sbr.rel (%p182_p3) target bundleno = 248 (0xf8), region = 36  ;;  %v268_v2 = vsel (!%p182_p3), %vm266_vm0, 4294967295, %v587_v1  ;;  %527 = vmatprep.mubr.msk.bf16.mxu0 (!%p182_p3), %vm259_vm1, %v561_v0  ;;  %v324_v3 = vld [vmem:[%s689_s2 + $0x10] sm:$0xff] (!%p182_p3)  ;;  %v322_v4 = vld [vmem:[%s689_s2] sm:$0xff] (!%p182_p3)  ;;  %v588_v5 = vmov (!%p182_p3), 0   ;;  %v325_v6 = vld [vmem:[%s689_s2 + $0x18] sm:$0xff] (!%p182_p3) }
   0x8   : > { %558 = vset.pattern.permute.xlu1 (!%p182_p3), %v588_v5  ;;  %557 = vset.pattern.permute.xlu0 (!%p182_p3), %v588_v5  ;;  %v323_v7 = vld [vmem:[%s689_s2 + $0x8] sm:$0xff] (!%p182_p3)  ;;  %v269_v9 = vsel (!%p182_p3), %vm267_vm2, %v268_v2, 0  ;;  %v350_v13 = vld [vmem:[%s690_s3] sm:$0xff] (!%p182_p3)  ;;  %v353_v15 = vld [vmem:[%s690_s3 + $0x18] sm:$0xff] (!%p182_p3) }
   0x9   : > { %338 = vperm.xlu1 (!%p182_p3), %558, %v324_v3   ;;  %328 = vperm.xlu0 (!%p182_p3), %557, %v322_v4   ;;  %v351_v12 = vld [vmem:[%s690_s3 + $0x8] sm:$0xff] (!%p182_p3)  ;;  %v352_v16 = vld [vmem:[%s690_s3 + $0x10] sm:$0xff] (!%p182_p3) }
   0xa   : > { %v562_v14 = vld [vmem:[%s687_s0 + $0x8] sm:$0xff] (!%p182_p3)  }
   0xd   : > { %343 = vperm.xlu1 (!%p182_p3), %558, %v325_v6   ;;  %333 = vperm.xlu0 (!%p182_p3), %557, %v323_v7  }
   0xe   : > { %s697_s15 = smov (!%p213_p4, %s577_s15), 1 }
   0xf   : > { %s502_s25 = sshll.u32 %s697_s15, 4 }
  0x10   : > { %s220_s28 = scalar_lea.vmem %s688_s1, %s502_s25  ;;  %s228_s23 = scalar_lea.vmem %s691_s4, %s502_s25 }
  0x11   : > { %v559_v8 = vld [vmem:[%s220_s28] sm:$0xff]   ;;  %v560_v10 = vld [vmem:[%s220_s28 + $0x8] sm:$0x3f]   ;;  %361 = vperm.xlu1 %558, %v351_v12   ;;  %356 = vperm.xlu0 %557, %v350_v13  }
  0x12   : > { %523 = vmatprep.subr.bf16.mxu0 %v559_v8  ;;  %v271_v11 = vand.u32 %v560_v10, %v269_v9 }
  0x13   : > { %524 = vmatpush3.bf16.msra.mxu0 %v559_v8 }
  0x14   : > { %525 = vmatprep.subr.bf16.mxu0 %v271_v11 }
  0x15   : > { %371 = vperm.xlu1 %558, %v353_v15   ;;  %366 = vperm.xlu0 %557, %v352_v16  }
  0x17   : > { %526 = vmatpush3.bf16.msra.mxu0 %v271_v11 }
  0x1a   : > { %528 = vmatmul.mubr.msk.bf16.vlgmr.msra.gmra.mrb[0].mxu0 %vm259_vm1, %v562_v14 }
  0x88   : > { %v339_v17 = vpop.permute.xlu1 %338  ;;  %v329_v18 = vpop.permute.xlu0 %328 }
  0x8c   : > { %v344_v19 = vpop.permute.xlu1 %343  ;;  %v334_v20 = vpop.permute.xlu0 %333 }
  0x90   : > { %v362_v21 = vpop.permute.xlu1 %361  ;;  %v357_v22 = vpop.permute.xlu0 %356 }
  0x94   : > { %v372_v30 = vpop.permute.xlu1 %371  ;;  %v367_v31 = vpop.permute.xlu0 %366 }
  0xed   : > { %v529_v23 = vpop.f32.mrb[0].mxu0 }
  0xee   : > { %v348_v24 = vmul.f32 %v529_v23, %v339_v17  ;;  %v307_v25 = vpop.f32.mrb[1].mxu0 }
  0xef   : > { %v346_v26 = vmul.f32 %v329_v18, %v307_v25  ;;  %v530_v27 = vpop.f32.mrb[2].mxu0 }
  0xf0   : > { %v349_v28 = vmul.f32 %v530_v27, %v344_v19  ;;  %v310_v29 = vpop.f32.mrb[3].mxu0  ;;  %v376_v33 = vadd.f32 %v367_v31, %v348_v24 }
  0xf1   : > { %v347_v32 = vmul.f32 %v334_v20, %v310_v29  ;;  %v374_v35 = vadd.f32 %v357_v22, %v346_v26 }
  0xf2   : > { %v377_v34 = vadd.f32 %v372_v30, %v349_v28 }
  0xf3   : > { %v375_v36 = vadd.f32 %v362_v21, %v347_v32 }
  0xf4   : > { %v516_v37 = vpack.c.bf16 %v377_v34, %v376_v33 }
  0xf5   : > { %v511_v38 = vpack.c.bf16 %v375_v36, %v374_v35 }
  0xf6   : > { %518 = vst [vmem:[%s228_s23 + $0x8] sm:$0xff] %v516_v37  }
  0xf7   : > { %512 = vst [vmem:[%s228_s23] sm:$0xff] %v511_v38  }
  0xf8 PF: > { %s14_s17 = sadd.s32 1, %s585_s17   ;;  %s692_s15 = smov %s581_s16 }
  0xf9   : > { %p11_p5 = scmp.ge.s32.totalorder %s14_s17, 4   ;;  %s693_s16 = smov %s695_s18 }
  0xfb   :  { %13 = sbr.rel (!%p11_p5) target bundleno = 2 (0x2), region = 66 }

</bundles_post_ra>
